<compile_context>
chip_gen: v7x
topology: tpu7x:2x2x1
jax: 0.10.0
libtpu: 0.0.40
codegen_flags: <defaults>
</compile_context>

<pallas_src>
import functools

import jax
import jax.numpy as jnp
import numpy as np
from jax import lax
from jax.experimental import pallas as pl
from jax.experimental.pallas import tpu as pltpu


def _make_odd(k: int) -> int:
    return k if k % 2 else k - 1


def _round_up(x: int, m: int) -> int:
    return (x + m - 1) // m * m


# ---------------------------------------------------------------------------
# Pallas kernel: one batch tile per grid step, a single im2col matmul plus a
# small maxpool-branch matmul and the projection shortcut.
# ---------------------------------------------------------------------------
def _inception_res_kernel(a_ref, wt_ref, wb_ref, wmp_ref, wproj_ref, sh_ref,
                          o_ref, *, L, P):
    B, Lc, KCp = a_ref.shape
    Cin, Cb = wb_ref.shape
    C4p = wt_ref.shape[1]

    # Lane-dense im2col rows; reshape (B, Lc, KCp) -> (B*Lc, KCp) is layout-free.
    a = a_ref[...].reshape(B * Lc, KCp)

    # (1) All three conv branches (bottleneck + BN scale folded) in ONE matmul:
    #     contraction depth K*Cin (156, lane-padded to 256), f32 accumulation.
    acc = jnp.dot(a, wt_ref[...], preferred_element_type=jnp.float32)

    # (2) MaxPool1d(3,1,1) branch: the bottleneck activation at positions
    #     l-1, l, l+1 comes from three Cin-wide windows of the same im2col row.
    c0 = (P - 1) * Cin
    wb = wb_ref[...]
    x_lft = a[:, c0:c0 + Cin]
    x_ctr = a[:, c0 + Cin:c0 + 2 * Cin]
    x_rgt = a[:, c0 + 2 * Cin:c0 + 3 * Cin]
    xb_l = jnp.dot(x_lft, wb, preferred_element_type=jnp.float32)
    xb_c = jnp.dot(x_ctr, wb, preferred_element_type=jnp.float32)
    xb_r = jnp.dot(x_rgt, wb, preferred_element_type=jnp.float32)
    # PyTorch pads the maxpool with -inf; our slab is zero padded (exact because
    # the bottleneck has bias=False), so mask the two sequence boundaries.
    ridx = lax.broadcasted_iota(jnp.int32, (B, Lc, 1), 1).reshape(B * Lc, 1)
    neg_inf = jnp.float32(-jnp.inf)
    xb_l = jnp.where(ridx == 0, neg_inf, xb_l)
    xb_r = jnp.where(ridx == L - 1, neg_inf, xb_r)
    mp = jnp.maximum(jnp.maximum(xb_l, xb_c), xb_r).astype(wmp_ref.dtype)
    acc = acc + jnp.dot(mp, wmp_ref[...], preferred_element_type=jnp.float32)

    # (3) Inception-block output: BN scale already folded -> add shift, ReLU.
    sh = sh_ref[...]                                   # (2, C4p), f32
    inc = jnp.maximum(acc + sh[0:1, :], 0.0)

    # (4) Projection shortcut: 1x1 conv on x (= centre im2col window), BN folded.
    proj = jnp.dot(x_ctr, wproj_ref[...],
                   preferred_element_type=jnp.float32) + sh[1:2, :]

    # (5) Residual add + final ReLU; lane-dense store (C4p multiple of 128).
    o_ref[...] = jnp.maximum(inc + proj, 0.0).reshape(B, Lc, C4p)


# ---------------------------------------------------------------------------
# Wrapper: BN folding, bottleneck folding, im2col layout, pallas_call.
# ---------------------------------------------------------------------------
def inception_block_residual(x_ncl, params, *, base_kernel_size=39,
                             batch_block=32, compute_dtype=jnp.bfloat16):
    N, Cin, L = x_ncl.shape
    Ks = tuple(_make_odd(base_kernel_size // 2 ** i) for i in range(3))
    K = Ks[0]
    P = K // 2
    assert L >= 2 and P >= 1
    Cb = params["w_bottleneck"].shape[0]
    Co = params["w_conv"][0].shape[0]
    C4 = 4 * Co
    C4p = _round_up(C4, 128)                 # lane-dense accumulator / output
    KC = K * Cin
    KCp = _round_up(KC, 128)                 # lane-dense im2col width
    eps = 1e-5

    # TODO(synk): training-mode BatchNorm (batch statistics) not implemented;
    # eval-mode running stats are folded into the weights / shift vectors here.
    def fold(gamma, beta, mean, var):
        s = gamma / jnp.sqrt(var + eps)
        return s, beta - mean * s

    bscale, bshift = fold(params["bn_gamma"], params["bn_beta"],
                          params["bn_mean"], params["bn_var"])
    pscale, pshift = fold(params["pbn_gamma"], params["pbn_beta"],
                          params["pbn_mean"], params["pbn_var"])

    wb_mat = params["w_bottleneck"][:, :, 0].astype(jnp.float32)     # (Cb, Cin)

    # Fused tap weights over RAW input channels (bottleneck + BN scale folded):
    # row (k*Cin + j) holds the effective tap-k weight of input channel j.
    # (Shorter branches are zero-padded to K taps; fine while not MXU-bound.)
    wt = jnp.zeros((KCp, C4p), jnp.float32)
    for i, (w, Ki) in enumerate(zip(params["w_conv"], Ks)):
        off = P - Ki // 2
        w_eff = jnp.einsum("ock,cj->kjo", w.astype(jnp.float32), wb_mat)
        w_eff = w_eff * bscale[i * Co:(i + 1) * Co]                  # (Ki, Cin, Co)
        wt = wt.at[off * Cin:(off + Ki) * Cin, i * Co:(i + 1) * Co].set(
            w_eff.reshape(Ki * Cin, Co))

    wb = wb_mat.T                                                    # (Cin, Cb)
    wmp = jnp.zeros((Cb, C4p), jnp.float32)
    wmp = wmp.at[:, 3 * Co:C4].set(
        params["w_mp"][:, :, 0].T.astype(jnp.float32) * bscale[3 * Co:C4])
    wproj = jnp.zeros((Cin, C4p), jnp.float32)
    wproj = wproj.at[:, :C4].set(
        params["w_proj"][:, :, 0].T.astype(jnp.float32) * pscale[None, :])
    shifts = jnp.zeros((2, C4p), jnp.float32)
    shifts = shifts.at[0, :C4].set(bshift).at[1, :C4].set(pshift)

    # Batch blocking: keep the im2col tile <= ~4 MiB (fits scoped VMEM with
    # double buffering on every generation) and ensure >= 2 grid steps when
    # N >= 2 so the "parallel" axis can shard across v7x's two TensorCores.
    Lc = _round_up(L, 8)
    itemsize = jnp.dtype(compute_dtype).itemsize
    cap = max(1, (4 << 20) // max(1, Lc * KCp * itemsize))
    B = max(1, min(batch_block, cap, N))
    if N >= 2:
        B = min(B, (N + 1) // 2)
    Nb = _round_up(N, B)

    # Lane-dense im2col slab built wrapper-side (layout plumbing, XLA):
    # A[n, l, k*Cin + j] = x_pad[n, l + k, j], last dim padded 156 -> 256.
    x_nlc = jnp.transpose(x_ncl, (0, 2, 1)).astype(jnp.float32)      # (N, L, Cin)
    x_pad = jnp.pad(x_nlc, ((0, Nb - N), (P, Lc - L + P), (0, 0)))   # (Nb, Lc+2P, Cin)
    cols = [x_pad[:, k:k + Lc, :] for k in range(K)]
    a = jnp.stack(cols, axis=2).reshape(Nb, Lc, KC)
    a = jnp.pad(a, ((0, 0), (0, 0), (0, KCp - KC))).astype(compute_dtype)

    wt = wt.astype(compute_dtype)
    wb = wb.astype(compute_dtype)
    wmp = wmp.astype(compute_dtype)
    wproj = wproj.astype(compute_dtype)

    kern = functools.partial(_inception_res_kernel, L=L, P=P)

    flops = 2 * Nb * Lc * (KCp * C4p + 3 * Cin * Cb + Cb * C4p + Cin * C4p)
    bytes_accessed = (a.size * itemsize + Nb * Lc * C4p * 4
                      + (wt.size + wb.size + wmp.size + wproj.size) * itemsize
                      + shifts.size * 4)

    out = pl.pallas_call(
        kern,
        out_shape=jax.ShapeDtypeStruct((Nb, Lc, C4p), jnp.float32),
        grid=(Nb // B,),
        in_specs=[
            pl.BlockSpec((B, Lc, KCp), lambda n: (n, 0, 0)),   # im2col activations
            pl.BlockSpec((KCp, C4p), lambda n: (0, 0)),        # fused tap weights
            pl.BlockSpec((Cin, Cb), lambda n: (0, 0)),         # bottleneck (maxpool path)
            pl.BlockSpec((Cb, C4p), lambda n: (0, 0)),         # maxpool-branch 1x1 W
            pl.BlockSpec((Cin, C4p), lambda n: (0, 0)),        # projection 1x1 W
            pl.BlockSpec((2, C4p), lambda n: (0, 0)),          # BN shift vectors
        ],
        out_specs=pl.BlockSpec((B, Lc, C4p), lambda n: (n, 0, 0)),
        compiler_params=pltpu.CompilerParams(
            dimension_semantics=("parallel",),
            vmem_limit_bytes=32 * 1024 * 1024),
        cost_estimate=pl.CostEstimate(flops=flops, transcendentals=0,
                                      bytes_accessed=bytes_accessed),
    )(a, wt, wb, wmp, wproj, shifts)

    # Drop batch / length / channel padding and return PyTorch NCL layout.
    return jnp.transpose(out[:N, :L, :C4], (0, 2, 1))


# ---------------------------------------------------------------------------
# Pure-JAX reference (NCL, matching PyTorch semantics) for a sanity check.
# ---------------------------------------------------------------------------
def _reference(x, params, *, base_kernel_size=39):
    eps = 1e-5
    Ks = [_make_odd(base_kernel_size // 2 ** i) for i in range(3)]

    def conv1d(y, w, pad):
        return lax.conv_general_dilated(y, w, window_strides=(1,),
                                        padding=[(pad, pad)],
                                        dimension_numbers=("NCH", "OIH", "NCH"))

    def bn(y, g, b, m, v):
        return ((y - m[None, :, None]) / jnp.sqrt(v[None, :, None] + eps)
                * g[None, :, None] + b[None, :, None])

    xb = conv1d(x, params["w_bottleneck"], 0)
    branches = [conv1d(xb, w, k // 2) for w, k in zip(params["w_conv"], Ks)]
    mp = lax.reduce_window(xb, -jnp.inf, lax.max, (1, 1, 3), (1, 1, 1),
                           [(0, 0), (0, 0), (1, 1)])
    branches.append(conv1d(mp, params["w_mp"], 0))
    cat = jnp.concatenate(branches, axis=1)
    inc = jax.nn.relu(bn(cat, params["bn_gamma"], params["bn_beta"],
                         params["bn_mean"], params["bn_var"]))
    sc = bn(conv1d(x, params["w_proj"], 0), params["pbn_gamma"],
            params["pbn_beta"], params["pbn_mean"], params["pbn_var"])
    return jax.nn.relu(inc + sc)


if __name__ == "__main__":
    N, Cin, L = 2, 4, 64          # batch, in_channels, sequence length
    Co, Cb = 8, 32                # out_channels per branch, bottleneck_channels
    C4 = 4 * Co
    Ks = [_make_odd(39 // 2 ** i) for i in range(3)]   # [39, 19, 9]

    key = jax.random.PRNGKey(0)
    keys = jax.random.split(key, 16)
    params = {
        "w_bottleneck": 0.1 * jax.random.normal(keys[0], (Cb, Cin, 1), jnp.float32),
        "w_conv": [0.1 * jax.random.normal(keys[1 + i], (Co, Cb, Ks[i]), jnp.float32)
                   for i in range(3)],
        "w_mp": 0.1 * jax.random.normal(keys[4], (Co, Cb, 1), jnp.float32),
        "w_proj": 0.1 * jax.random.normal(keys[5], (C4, Cin, 1), jnp.float32),
        "bn_gamma": 0.5 + jax.random.uniform(keys[6], (C4,), jnp.float32),
        "bn_beta": 0.1 * jax.random.normal(keys[7], (C4,), jnp.float32),
        "bn_mean": 0.1 * jax.random.normal(keys[8], (C4,), jnp.float32),
        "bn_var": 0.5 + jax.random.uniform(keys[9], (C4,), jnp.float32),
        "pbn_gamma": 0.5 + jax.random.uniform(keys[10], (C4,), jnp.float32),
        "pbn_beta": 0.1 * jax.random.normal(keys[11], (C4,), jnp.float32),
        "pbn_mean": 0.1 * jax.random.normal(keys[12], (C4,), jnp.float32),
        "pbn_var": 0.5 + jax.random.uniform(keys[13], (C4,), jnp.float32),
    }

    x = jax.random.normal(keys[15], (N, Cin, L), jnp.float32)   # PyTorch NCL layout

    out = jax.block_until_ready(inception_block_residual(x, params))
    assert out.shape == (N, C4, L), out.shape

    ref = jax.block_until_ready(_reference(x, params))
    np.testing.assert_allclose(np.asarray(out), np.asarray(ref), rtol=5e-2, atol=5e-2)

    print("KERNEL_OK")
</pallas_src>

<mosaic_0001>
module attributes {stable_mosaic.version = 11 : i64} {
  func.func @_inception_res_kernel(%arg0: i32, %arg1: memref<1x64x256xbf16, #tpu.memory_space<vmem>>, %arg2: memref<256x128xbf16, #tpu.memory_space<vmem>>, %arg3: memref<4x32xbf16, #tpu.memory_space<vmem>>, %arg4: memref<32x128xbf16, #tpu.memory_space<vmem>>, %arg5: memref<4x128xbf16, #tpu.memory_space<vmem>>, %arg6: memref<2x128xf32, #tpu.memory_space<vmem>>, %arg7: memref<1x64x128xf32, #tpu.memory_space<vmem>>) attributes {dimension_semantics = [#tpu.dimension_semantics<parallel>], iteration_bounds = array<i64: 2>, scalar_prefetch = 0 : i64, scratch_operands = 0 : i64, tpu.core_type = #tpu.core_type<tc>, window_params = [{transform_indices = @transform_0, window_bounds = array<i64: 1, 64, 256>}, {pipeline_mode = #tpu.pipeline_mode<synchronous>, transform_indices = @transform_1, window_bounds = array<i64: 256, 128>}, {pipeline_mode = #tpu.pipeline_mode<synchronous>, transform_indices = @transform_2, window_bounds = array<i64: 4, 32>}, {pipeline_mode = #tpu.pipeline_mode<synchronous>, transform_indices = @transform_3, window_bounds = array<i64: 32, 128>}, {pipeline_mode = #tpu.pipeline_mode<synchronous>, transform_indices = @transform_4, window_bounds = array<i64: 4, 128>}, {pipeline_mode = #tpu.pipeline_mode<synchronous>, transform_indices = @transform_5, window_bounds = array<i64: 2, 128>}, {transform_indices = @transform_6, window_bounds = array<i64: 1, 64, 128>}]} {
    %c0 = arith.constant 0 : index
    %c0_0 = arith.constant 0 : index
    %c0_1 = arith.constant 0 : index
    %0 = vector.load %arg1[%c0, %c0_0, %c0_1] : memref<1x64x256xbf16, #tpu.memory_space<vmem>>, vector<1x64x256xbf16>
    %1 = vector.shape_cast %0 : vector<1x64x256xbf16> to vector<64x256xbf16>
    %c0_2 = arith.constant 0 : index
    %c0_3 = arith.constant 0 : index
    %2 = vector.load %arg2[%c0_2, %c0_3] : memref<256x128xbf16, #tpu.memory_space<vmem>>, vector<256x128xbf16>
    %cst = arith.constant dense<0.000000e+00> : vector<64x128xf32>
    %3 = tpu.matmul %1, %2, %cst {dimension_numbers = #tpu.dot_dimension_numbers<[1], [0], [0], [1], [0, 0, 1, 1], [], []>} : vector<64x256xbf16>, vector<256x128xbf16>, vector<64x128xf32> -> vector<64x128xf32>
    %c0_4 = arith.constant 0 : index
    %c0_5 = arith.constant 0 : index
    %4 = vector.load %arg3[%c0_4, %c0_5] : memref<4x32xbf16, #tpu.memory_space<vmem>>, vector<4x32xbf16>
    %5 = vector.extract_strided_slice %1 {offsets = [0, 72], sizes = [64, 4], strides = [1, 1]} : vector<64x256xbf16> to vector<64x4xbf16>
    %6 = vector.extract_strided_slice %1 {offsets = [0, 76], sizes = [64, 4], strides = [1, 1]} : vector<64x256xbf16> to vector<64x4xbf16>
    %7 = vector.extract_strided_slice %1 {offsets = [0, 80], sizes = [64, 4], strides = [1, 1]} : vector<64x256xbf16> to vector<64x4xbf16>
    %cst_6 = arith.constant dense<0.000000e+00> : vector<64x32xf32>
    %8 = tpu.matmul %5, %4, %cst_6 {dimension_numbers = #tpu.dot_dimension_numbers<[1], [0], [0], [1], [0, 0, 1, 1], [], []>} : vector<64x4xbf16>, vector<4x32xbf16>, vector<64x32xf32> -> vector<64x32xf32>
    %cst_7 = arith.constant dense<0.000000e+00> : vector<64x32xf32>
    %9 = tpu.matmul %6, %4, %cst_7 {dimension_numbers = #tpu.dot_dimension_numbers<[1], [0], [0], [1], [0, 0, 1, 1], [], []>} : vector<64x4xbf16>, vector<4x32xbf16>, vector<64x32xf32> -> vector<64x32xf32>
    %cst_8 = arith.constant dense<0.000000e+00> : vector<64x32xf32>
    %10 = tpu.matmul %7, %4, %cst_8 {dimension_numbers = #tpu.dot_dimension_numbers<[1], [0], [0], [1], [0, 0, 1, 1], [], []>} : vector<64x4xbf16>, vector<4x32xbf16>, vector<64x32xf32> -> vector<64x32xf32>
    %11 = tpu.iota {dimensions = array<i32: 1>} : vector<1x64x1xi32>
    %12 = vector.shape_cast %11 : vector<1x64x1xi32> to vector<64x1xi32>
    %c0_i32 = arith.constant 0 : i32
    %13 = vector.broadcast %c0_i32 : i32 to vector<64x1xi32>
    %14 = arith.cmpi eq, %12, %13 : vector<64x1xi32>
    %cst_9 = arith.constant 0xFF800000 : f32
    %15 = vector.shape_cast %14 : vector<64x1xi1> to vector<64x1xi1>
    %16 = vector.broadcast %15 : vector<64x1xi1> to vector<64x32xi1>
    %17 = vector.broadcast %cst_9 : f32 to vector<64x32xf32>
    %18 = arith.select %16, %17, %8 : vector<64x32xi1>, vector<64x32xf32>
    %c63_i32 = arith.constant 63 : i32
    %19 = vector.broadcast %c63_i32 : i32 to vector<64x1xi32>
    %20 = arith.cmpi eq, %12, %19 : vector<64x1xi32>
    %cst_10 = arith.constant 0xFF800000 : f32
    %21 = vector.shape_cast %20 : vector<64x1xi1> to vector<64x1xi1>
    %22 = vector.broadcast %21 : vector<64x1xi1> to vector<64x32xi1>
    %23 = vector.broadcast %cst_10 : f32 to vector<64x32xf32>
    %24 = arith.select %22, %23, %10 : vector<64x32xi1>, vector<64x32xf32>
    %25 = arith.maximumf %18, %9 : vector<64x32xf32>
    %26 = arith.maximumf %25, %24 : vector<64x32xf32>
    %27 = arith.truncf %26 : vector<64x32xf32> to vector<64x32xbf16>
    %c0_11 = arith.constant 0 : index
    %c0_12 = arith.constant 0 : index
    %28 = vector.load %arg4[%c0_11, %c0_12] : memref<32x128xbf16, #tpu.memory_space<vmem>>, vector<32x128xbf16>
    %cst_13 = arith.constant dense<0.000000e+00> : vector<64x128xf32>
    %29 = tpu.matmul %27, %28, %cst_13 {dimension_numbers = #tpu.dot_dimension_numbers<[1], [0], [0], [1], [0, 0, 1, 1], [], []>} : vector<64x32xbf16>, vector<32x128xbf16>, vector<64x128xf32> -> vector<64x128xf32>
    %30 = arith.addf %3, %29 : vector<64x128xf32>
    %c0_14 = arith.constant 0 : index
    %c0_15 = arith.constant 0 : index
    %31 = vector.load %arg6[%c0_14, %c0_15] : memref<2x128xf32, #tpu.memory_space<vmem>>, vector<2x128xf32>
    %32 = vector.extract_strided_slice %31 {offsets = [0, 0], sizes = [1, 128], strides = [1, 1]} : vector<2x128xf32> to vector<1x128xf32>
    %33 = vector.broadcast %32 : vector<1x128xf32> to vector<64x128xf32>
    %34 = arith.addf %30, %33 : vector<64x128xf32>
    %cst_16 = arith.constant 0.000000e+00 : f32
    %35 = vector.broadcast %cst_16 : f32 to vector<64x128xf32>
    %36 = arith.maximumf %34, %35 : vector<64x128xf32>
    %c0_17 = arith.constant 0 : index
    %c0_18 = arith.constant 0 : index
    %37 = vector.load %arg5[%c0_17, %c0_18] : memref<4x128xbf16, #tpu.memory_space<vmem>>, vector<4x128xbf16>
    %cst_19 = arith.constant dense<0.000000e+00> : vector<64x128xf32>
    %38 = tpu.matmul %6, %37, %cst_19 {dimension_numbers = #tpu.dot_dimension_numbers<[1], [0], [0], [1], [0, 0, 1, 1], [], []>} : vector<64x4xbf16>, vector<4x128xbf16>, vector<64x128xf32> -> vector<64x128xf32>
    %39 = vector.extract_strided_slice %31 {offsets = [1, 0], sizes = [1, 128], strides = [1, 1]} : vector<2x128xf32> to vector<1x128xf32>
    %40 = vector.broadcast %39 : vector<1x128xf32> to vector<64x128xf32>
    %41 = arith.addf %38, %40 : vector<64x128xf32>
    %42 = arith.addf %36, %41 : vector<64x128xf32>
    %cst_20 = arith.constant 0.000000e+00 : f32
    %43 = vector.broadcast %cst_20 : f32 to vector<64x128xf32>
    %44 = arith.maximumf %42, %43 : vector<64x128xf32>
    %45 = vector.shape_cast %44 : vector<64x128xf32> to vector<1x64x128xf32>
    %c0_21 = arith.constant 0 : index
    %c0_22 = arith.constant 0 : index
    %c0_23 = arith.constant 0 : index
    %46 = vector.load %arg7[%c0_21, %c0_22, %c0_23] : memref<1x64x128xf32, #tpu.memory_space<vmem>>, vector<1x64x128xf32>
    tpu.vector_store %arg7[%c0_21, %c0_22, %c0_23], %45 {strides = array<i32>} : memref<1x64x128xf32, #tpu.memory_space<vmem>>, vector<1x64x128xf32>,
    return
  }
  func.func @transform_0(%arg0: i32) -> (i32, i32, i32) {
    %c0_i32 = arith.constant 0 : i32
    %c0_i32_0 = arith.constant 0 : i32
    %c0_i32_1 = arith.constant 0 : i32
    return %arg0, %c0_i32, %c0_i32_0 : i32, i32, i32
  }
  func.func @transform_1(%arg0: i32) -> (i32, i32) {
    %c0_i32 = arith.constant 0 : i32
    %c0_i32_0 = arith.constant 0 : i32
    %c0_i32_1 = arith.constant 0 : i32
    return %c0_i32, %c0_i32_0 : i32, i32
  }
  func.func @transform_2(%arg0: i32) -> (i32, i32) {
    %c0_i32 = arith.constant 0 : i32
    %c0_i32_0 = arith.constant 0 : i32
    %c0_i32_1 = arith.constant 0 : i32
    return %c0_i32, %c0_i32_0 : i32, i32
  }
  func.func @transform_3(%arg0: i32) -> (i32, i32) {
    %c0_i32 = arith.constant 0 : i32
    %c0_i32_0 = arith.constant 0 : i32
    %c0_i32_1 = arith.constant 0 : i32
    return %c0_i32, %c0_i32_0 : i32, i32
  }
  func.func @transform_4(%arg0: i32) -> (i32, i32) {
    %c0_i32 = arith.constant 0 : i32
    %c0_i32_0 = arith.constant 0 : i32
    %c0_i32_1 = arith.constant 0 : i32
    return %c0_i32, %c0_i32_0 : i32, i32
  }
  func.func @transform_5(%arg0: i32) -> (i32, i32) {
    %c0_i32 = arith.constant 0 : i32
    %c0_i32_0 = arith.constant 0 : i32
    %c0_i32_1 = arith.constant 0 : i32
    return %c0_i32, %c0_i32_0 : i32, i32
  }
  func.func @transform_6(%arg0: i32) -> (i32, i32, i32) {
    %c0_i32 = arith.constant 0 : i32
    %c0_i32_0 = arith.constant 0 : i32
    %c0_i32_1 = arith.constant 0 : i32
    return %arg0, %c0_i32, %c0_i32_0 : i32, i32, i32
  }
}

</mosaic_0001>

<bundles_post_ra>
// kernel: tpu_custom_call.1
= control target key start
LH: loop header
LB: loop body
LE: loop exit
PB: predicated region body
PF: predicated region fallthrough
CT: control target
= control target key end

     0   :  { %11 = vsyncpa [#allocation3], 0  ;;  %s2053_s0 = inlined_call_operand.hbm [shape: bf16[2,64,256], index: 0, kind: input, shape index: {}]   ;;  %s2054_s1 = inlined_call_operand.hbm [shape: bf16[256,128], index: 1, kind: input, shape index: {}]   ;;  %s2055_s2 = inlined_call_operand.vmem [shape: bf16[4,32], index: 2, kind: input, shape index: {}]   ;;  %s2056_s3 = inlined_call_operand.hbm [shape: bf16[32,128], index: 3, kind: input, shape index: {}]   ;;  %s2057_s4 = inlined_call_operand.vmem [shape: bf16[4,128], index: 4, kind: input, shape index: {}]   ;;  %s2058_s5 = inlined_call_operand.vmem [shape: f32[2,128], index: 5, kind: input, shape index: {}]   ;;  %s2059_s6 = inlined_call_operand.hbm [shape: f32[2,64,128], index: 6, kind: output, shape index: {}]  }
   0x1   :  { %13 = vsyncpa [#allocation3 + $0x1], 0 }
   0x2   :  { %14 = vsyncpa [#allocation6], 0 }
   0x3   :  { %15 = vsyncpa [#allocation4], 0 }
   0x4   :  { %17 = vsyncpa [#allocation4 + $0x1], 0  ;;  %s1713_s21 = smov 0   ;;  %s1715_s22 = smov 0  }
   0x5   :  { %s1717_s23 = smov 0   ;;  %s1719_s24 = smov 0  }
   0x6 LB: > { %s1734_s25 = sadd.s32 4294967295, %s1663_s24   ;;  %s1213_s26 = sadd.s32 4294967294, %s1663_s24   ;;  %s1663_s24 = sphi %s1719_s24, %s2079_s24   ;;  %s1659_s23 = sphi %s1717_s23, %s2078_s23   ;;  %s1655_s22 = sphi %s1715_s22, %s2077_s22   ;;  %s1651_s21 = sphi %s1713_s21, %s2076_s21  }
   0x7   : > { %p43_p0 = scmp.ne.s32.totalorder %s1655_s22, %s1651_s21  ;;  %p2060_p1 = scmp.eq.s32.totalorder %s1734_s25, 0 }
   0x8   : > { %p178_p3 = scmp.eq.s32.totalorder %s1213_s26, 1  ;;  %p1214_p5 = scmp.ge.s32.totalorder %s1663_s24, 1 }
   0x9   : > { %p1743_p4 = por %p2060_p1, %p43_p0  ;;  %p185_p7 = scmp.lt.s32.totalorder %s1663_s24, 3 }
   0xa   : > { %p1748_p6 = por %p178_p3, %p43_p0  ;;  %s1665_s30 = smov [#allocation5]  }
   0xb   : > { %s2063_s27 = scalar_select %p1743_p4, 1, 0 }
   0xc   : > { %s2064_s28 = scalar_select %p1748_p6, 1, 0 }
   0xd   : > { %p1753_p8 = pnand %p1214_p5, %p185_p7  ;;  %s197_s7 = sshll.u32 %s1665_s30, 4  ;;  %s1757_s7 = int_to_ptr.vmem [resolvable:$true] %s197_s7 }
   0xe   : > { %s1666_s9 = smov [#allocation7]   ;;  %s1507_s13 = scalar_lea.hbm %s2054_s1, 2048 }
   0xf   : > { %p1413_p9 = pneg %p1753_p8  ;;  %s213_s10 = sshll.u32 %s1666_s9, 4  ;;  %s1768_s10 = int_to_ptr.vmem [resolvable:$true] %s213_s10 }
  0x10   : > { %p1508_p12 = scmp.ne.s32.totalorder %s2054_s1, %s1507_s13  ;;  %p1514_p5 = scmp.lt.u32.totalorder %s1507_s13, %s2054_s1 }
  0x11   : > { %p1764_p11 = pnand %p1413_p9, %p2060_p1 }
  0x13   : > { %p1509_p13 = pneg %p1764_p11 }
  0x15   : > { %p1510_p0 = pnand %p1509_p13, %p1508_p12 }
  0x17   : > { %p1511_p3 = pneg %p1510_p0 }
  0x19   : > { %p1516_p7 = pnand %p1514_p5, %p1511_p3 }
  0x1b   : > { %1519 = shalt.err (!%p1516_p7)
}
  0x1c   : > { %s1520_s18 = scalar_lea.vmem %s1757_s7, 2048  ;;  %p1528_p2 = scmp.lt.s32.totalorder %s1757_s7, %s1757_s7 }
  0x1d   : > { %p1521_p9 = scmp.ne.s32.totalorder %s1757_s7, %s1520_s18  ;;  %p1529_p12 = scmp.lt.s32.totalorder %s1520_s18, %s1520_s18 }
  0x1f   : > { %p1523_p10 = pnand %p1521_p9, %p1509_p13  ;;  %p1530_p0 = por %p1529_p12, %p1528_p2 }
  0x21   : > { %p1524_p1 = pneg %p1523_p10 }
  0x23   : > { %p1531_p6 = pnand %p1530_p0, %p1524_p1 }
  0x25   : > { %1534 = shalt.err (!%p1531_p6)
}
  0x26   : > { %s1667_s19 = smov 64   ;;  %s1668_s20 = smov 4  }
  0x27   : > { %1416 = dma.hbm_to_vmem [thread:$0]  (!%p1764_p11), %s2054_s1, 2048, %s1757_s7, [#allocation6], %s1667_s19, %s1667_s19, %s1668_s20  }
  0x28   : > { %s1535_s12 = scalar_lea.hbm %s2056_s3, 256 }
  0x29   : > { %p1536_p2 = scmp.ne.s32.totalorder %s2056_s3, %s1535_s12  ;;  %p1542_p10 = scmp.lt.u32.totalorder %s1535_s12, %s2056_s3 }
  0x2b   : > { %p1538_p1 = pnand %p1536_p2, %p1509_p13 }
  0x2d   : > { %p1539_p6 = pneg %p1538_p1 }
  0x2f   : > { %p1544_p3 = pnand %p1542_p10, %p1539_p6 }
  0x31   : > { %1547 = shalt.err (!%p1544_p3)
}
  0x32   : > { %s1548_s7 = scalar_lea.vmem %s1768_s10, 256  ;;  %p1556_p12 = scmp.lt.s32.totalorder %s1768_s10, %s1768_s10 }
  0x33   : > { %p1549_p5 = scmp.ne.s32.totalorder %s1768_s10, %s1548_s7  ;;  %p1557_p0 = scmp.lt.s32.totalorder %s1548_s7, %s1548_s7 }
  0x35   : > { %p1551_p7 = pnand %p1549_p5, %p1509_p13  ;;  %p1558_p2 = por %p1557_p0, %p1556_p12 }
  0x37   : > { %p1552_p9 = pneg %p1551_p7 }
  0x39   : > { %p1559_p1 = pnand %p1558_p2, %p1552_p9 }
  0x3b   : > { %1562 = shalt.err (!%p1559_p1)
}
  0x3c   : > { %1419 = dma.hbm_to_vmem [thread:$0]  (!%p1764_p11), %s2056_s3, 256, %s1768_s10, [#allocation6], %s1667_s19, %s1667_s19, %s1668_s20  }
  0x3d   : > { %s1823_s26 = sadd.s32 1, %s1663_s24   ;;  %s30_s8 = sadd.s32 1, %s1659_s23 }
  0x3e   : > { %s27_s30 = ssub.s32 %s1663_s24, %s1823_s26  ;;  %p37_p13 = scmp.ne.s32.totalorder %s1659_s23, %s1655_s22 }
  0x3f   : > { %p28_p6 = scmp.eq.s32.totalorder %s27_s30, 0  ;;  %p38_p10 = scmp.eq.s32.totalorder %s1663_s24, 0 }
  0x40   : > { %p2067_p3 = scmp.eq.s32.totalorder %s1734_s25, 1  ;;  %p1430_p7 = scmp.lt.s32.totalorder %s1663_s24, 2 }
  0x41   : > { %s1839_s11 = scalar_select %p28_p6, %s1659_s23, %s30_s8  }
  0x42   : > { %p1833_p5 = por %p2067_p3, %p37_p13  ;;  %p39_p9 = por %p38_p10, %p37_p13 }
  0x43   : > { %s233_s12 = sand.u32 1, %s1659_s23   ;;  %s1277_s10 = sshll.u32 %s1663_s24, 10 }
  0x44   : > { %s2068_s9 = scalar_select %p1833_p5, 1, 0 }
  0x45   : > { %s1218_s13 = sshll.u32 %s233_s12, 6  ;;  %s1846_s14 = scalar_lea.hbm %s2053_s0, %s1277_s10 }
  0x46   : > { %s237_s15 = scalar_lea.vmem [#allocation2], %s1218_s13  ;;  %p1850_p11 = pnand %p1430_p7, %p39_p9 }
  0x47   : > { %s244_s16 = sshll.u32 %s237_s15, 4  ;;  %s1854_s17 = scalar_lea.sflag [#allocation3], %s233_s12  ;;  %s1848_s16 = int_to_ptr.vmem [resolvable:$true] %s244_s16 }
  0x48   : > { %s1563_s18 = scalar_lea.hbm %s1846_s14, 1024  ;;  %p1565_p0 = pneg %p1850_p11 }
  0x49   : > { %p1564_p12 = scmp.ne.s32.totalorder %s1846_s14, %s1563_s18  ;;  %s1568_s13 = scalar_lea.hbm %s2053_s0, 2048 }
  0x4a   : > { %p1569_p13 = scmp.lt.u32.totalorder %s1846_s14, %s2053_s0  ;;  %p1570_p6 = scmp.lt.u32.totalorder %s1568_s13, %s1563_s18 }
  0x4b   : > { %p1566_p2 = pnand %p1565_p0, %p1564_p12  ;;  %p1572_p3 = scmp.lt.u32.totalorder %s1563_s18, %s1846_s14 }
  0x4c   : > { %p1571_p10 = por %p1570_p6, %p1569_p13 }
  0x4d   : > { %p1567_p1 = pneg %p1566_p2 }
  0x4e   : > { %p1573_p7 = por %p1572_p3, %p1571_p10 }
  0x50   : > { %p1574_p9 = pnand %p1573_p7, %p1567_p1 }
  0x52   : > { %1577 = shalt.err (!%p1574_p9)
}
  0x53   : > { %s1578_s12 = scalar_lea.vmem %s1848_s16, 1024  ;;  %s1669_s20 = smov [#allocation2]  }
  0x54   : > { %p1579_p12 = scmp.ne.s32.totalorder %s1848_s16, %s1578_s12  ;;  %s1583_s15 = sshll.u32 %s1669_s20, 4  ;;  %s1584_s15 = int_to_ptr.vmem [resolvable:$false] %s1583_s15 }
  0x55   : > { %s1585_s8 = scalar_lea.vmem %s1584_s15, 2048  ;;  %p1586_p4 = scmp.lt.s32.totalorder %s1848_s16, %s1584_s15 }
  0x56   : > { %p1581_p2 = pnand %p1579_p12, %p1565_p0  ;;  %p1587_p13 = scmp.lt.s32.totalorder %s1585_s8, %s1578_s12 }
  0x58   : > { %p1582_p5 = pneg %p1581_p2  ;;  %p1588_p6 = por %p1587_p13, %p1586_p4 }
  0x5a   : > { %p1589_p10 = pnand %p1588_p6, %p1582_p5 }
  0x5c   : > { %1592 = shalt.err (!%p1589_p10)
}
  0x5d   : > { %s1670_s18 = smov 128   ;;  %s1671_s30 = smov 8  }
  0x5e   : > { %1423 = dma.hbm_to_vmem [thread:$0]  (!%p1850_p11), %s1846_s14, 1024, %s1848_s16, %s1854_s17, %s1670_s18, %s1670_s18, %s1671_s30  }
  0x5f   : > { %256 = sbr.rel (%p1753_p8) target bundleno = 724 (0x2d4), region = 44  ;;  %s1885_s13 = sand.u32 (!%p1753_p8), 1, %s1655_s22  }
  0x60   : > { %s1222_s10 = sshll.u32 (!%p1753_p8), %s1885_s13, 6  ;;  %s259_s19 = scalar_lea.sflag (!%p1753_p8), [#allocation3], %s1885_s13 }
  0x61   : > { %s1891_s12 = scalar_lea.vmem (!%p1753_p8), [#allocation2], %s1222_s10  ;;  %p2070_p4 = scmp.ne.s32.totalorder (!%p1753_p8), %s2063_s27, 0 }
  0x66   : > { %1638 = dma.done.wait (%p2070_p4), %s259_s19, 1024  }
  0x67   : > { %1640 = vsyncadd (%p2070_p4), %s259_s19, 4294966272  ;;  %p2071_p5 = scmp.eq.s32.totalorder %s1734_s25, 0 }
  0x69   : > { %1642 = dma.done.wait (%p2071_p5), [#allocation6], 2304   ;;  %p2072_p8 = pmov %p2071_p5 }
  0x6a   : > { %v1902_v0 = vld [vmem:[%s1891_s12] ss:$8 sps:$4 sm:$0xff]   ;;  %v1905_v1 = vld [vmem:[%s1891_s12 + $0x10] ss:$8 sps:$4 sm:$0xff]   ;;  %s1672_s29 = smov 56   ;;  %vm382_vm0 = vcmask 1041408   ;;  %v621_v45 = vlaneseq }
  0x6b   : > { %1644 = vsyncadd (%p2072_p8), [#allocation6], 4294964992  ;;  %361 = vrot.lane.b32.xlu0 %v1902_v0, %s1672_s29  ;;  %v1909_v2 = vld [vmem:[%s1891_s12 + $0x20] ss:$8 sps:$4 sm:$0xff]   ;;  %v1912_v3 = vld [vmem:[%s1891_s12 + $0x30] ss:$8 sps:$4 sm:$0xff]  }
  0x6c   : > { %365 = vrot.lane.b32.xlu1 %v1909_v2, %s1672_s29  ;;  %v340_v4 = vld [vmem:[%s2055_s2] sm:$0x3]  ;;  %s1673_s16 = smov 52   ;;  %s1674_s7 = smov 48   ;;  %vm369_vm1 = vcmask 31744   ;;  %v1487_v15 = vld [vmem:[#allocation5 + $0x48] sm:$0xff]  }
  0x6d   : > { %1397 = vmatprep.subr.msk.bf16.mxu1 %vm382_vm0, %v340_v4  ;;  %v384_v5 = vsel %vm382_vm0, %v340_v4, 0  ;;  %1399 = vmatprep.subr.msk.bf16.mxu0 %vm382_vm0, %v340_v4  ;;  %v1485_v6 = vld [vmem:[#allocation5 + $0x40] sm:$0xff]   ;;  %v1488_v18 = vld [vmem:[#allocation5 + $0x8] sm:$0xff]   ;;  %v1489_v20 = vld [vmem:[#allocation5 + $0x50] sm:$0xff]   ;;  %v1968_v48 = vshrl.u32 %v621_v45, 7  ;;  %vm730_vm4 = vcmask 261120  }
  0x6e   : > { %1346 = vmatpush3.bf16.msra.mxu1 %v384_v5  ;;  %1366 = vmatpush3.bf16.msra.mxu0 %v384_v5  ;;  %v1486_v14 = vld [vmem:[#allocation5] sm:$0xff]   ;;  %v1490_v22 = vld [vmem:[#allocation5 + $0x10] sm:$0xff]   ;;  %v1491_v23 = vld [vmem:[#allocation5 + $0x58] sm:$0xff]   ;;  %s1992_s18 = scalar_lea.vmem [#allocation8], %s1222_s10  ;;  %s1278_s10 = sshll.u32 %s1734_s25, 10 }
  0x6f   : > { %363 = vrot.lane.b32.xlu0 %v1905_v1, %s1672_s29  ;;  %1398 = vmatprep.subr.msk.bf16.mxu1 %vm382_vm0, %v340_v4  ;;  %v1492_v25 = vld [vmem:[#allocation5 + $0x18] sm:$0xff]   ;;  %v1493_v26 = vld [vmem:[#allocation5 + $0x60] sm:$0xff]   ;;  %v1495_v28 = vld [vmem:[#allocation5 + $0x68] sm:$0xff]   ;;  %vm630_vm2 = vcmp.eq.s32.totalorder %v1968_v48, 0  ;;  %s1121_s30 = sshll.u32 %s1992_s18, 4  ;;  %s1108_s25 = scalar_lea.sflag [#allocation4], %s1885_s13  ;;  %s2000_s30 = int_to_ptr.vmem [resolvable:$true] %s1121_s30 }
  0x70   : > { %367 = vrot.lane.b32.xlu1 %v1912_v3, %s1672_s29  ;;  %1300 = vmatprep.subr.bf16.mxu0 %v1485_v6  ;;  %v1494_v27 = vld [vmem:[#allocation5 + $0x20] sm:$0xff]   ;;  %v1496_v29 = vld [vmem:[#allocation5 + $0x28] sm:$0xff]   ;;  %v1497_v30 = vld [vmem:[#allocation5 + $0x70] sm:$0xff]   ;;  %s2006_s29 = scalar_lea.hbm %s2059_s6, %s1278_s10  ;;  %s1593_s27 = scalar_lea.vmem %s2000_s30, 1024 }
  0x71   : > { %v1498_v31 = vld [vmem:[#allocation5 + $0x30] sm:$0xff]   ;;  %v1499_v32 = vld [vmem:[#allocation5 + $0x78] sm:$0xff]   ;;  %v1501_v34 = vld [vmem:[%s1891_s12 + $0x4] ss:$8 sps:$4 sm:$0xff]   ;;  %p1594_p11 = scmp.ne.s32.totalorder %s2000_s30, %s1593_s27  ;;  %p2073_p0 = scmp.ne.s32.totalorder %s2068_s9, 0 }
  0x72   : > { %v1500_v33 = vld [vmem:[#allocation5 + $0x38] sm:$0xff]   ;;  %v1502_v35 = vld [vmem:[#allocation7] sm:$0xff]   ;;  %v1504_v37 = vld [vmem:[#allocation7 + $0x8] sm:$0xff]   ;;  %s1675_s14 = smov [#allocation8]  }
  0x73   : > { %451 = vrot.lane.b32.xlu0 %v1902_v0, %s1673_s16  ;;  %v1503_v36 = vld [vmem:[%s1891_s12 + $0x14] ss:$8 sps:$4 sm:$0xff]   ;;  %v1505_v38 = vld [vmem:[%s1891_s12 + $0x24] ss:$8 sps:$4 sm:$0xff]   ;;  %v1010_v40 = vld [vmem:[%s2057_s4] sm:$0x3]  ;;  %p1595_p1 = pnand %p1594_p11, %p2073_p0 }
  0x74   : > { %453 = vrot.lane.b32.xlu1 %v1905_v1, %s1673_s16  ;;  %v1506_v39 = vld [vmem:[%s1891_s12 + $0x34] ss:$8 sps:$4 sm:$0xff]  }
  0x75   : > { %p1596_p3 = pneg %p1595_p1 }
  0x77   : > { %536 = vrot.lane.b32.xlu0 %v1902_v0, %s1674_s7 }
  0x78   : > { %538 = vrot.lane.b32.xlu1 %v1905_v1, %s1674_s7 }
  0x7b   : > { %455 = vrot.lane.b32.xlu0 %v1909_v2, %s1673_s16 }
  0x7c   : > { %457 = vrot.lane.b32.xlu1 %v1912_v3, %s1673_s16  ;;  %s1597_s16 = sshll.u32 %s1675_s14, 4  ;;  %s1598_s16 = int_to_ptr.vmem [resolvable:$false] %s1597_s16 }
  0x7d   : > { %p1600_p7 = scmp.lt.s32.totalorder %s2000_s30, %s1598_s16 }
  0x7f   : > { %540 = vrot.lane.b32.xlu0 %v1909_v2, %s1674_s7 }
  0x80   : > { %542 = vrot.lane.b32.xlu1 %v1912_v3, %s1674_s7  ;;  %s1599_s7 = scalar_lea.vmem %s1598_s16, 2048 }
  0x81   : > { %p1601_p9 = scmp.lt.s32.totalorder %s1599_s7, %s1593_s27 }
  0x83   : > { %p1602_p12 = por %p1601_p9, %p1600_p7 }
  0x85   : > { %p1603_p2 = pnand %p1602_p12, %p1596_p3 }
  0xdd   : > { %v362_v7 = vpop.permute.xlu0 %361 }
  0xde   : > { %1347 = vmatprep.mubr.msk.bf16.mxu1 %vm369_vm1, %v362_v7  ;;  %v366_v8 = vpop.permute.xlu1 %365 }
  0xe1   : > { %v364_v9 = vpop.permute.xlu0 %363 }
  0xe2   : > { %1348 = vmatmul.mubr.msk.bf16.vlgmr.msra.gmra.mrb[0].mxu1 %vm369_vm1, %v364_v9  ;;  %v368_v10 = vpop.permute.xlu1 %367 }
  0xe3   : > { %1356 = vmatpush3.bf16.msra.mxu1 %v384_v5  ;;  %1351 = vmatprep.mubr.msk.bf16.mxu1 %vm369_vm1, %v366_v8 }
  0xe4   : > { %1375 = vmatprep.subr.bf16.mxu1 %v1502_v35 }
  0xe5   : > { %v1935_v11 = vpop.permute.xlu0 %451 }
  0xe6   : > { %v1937_v12 = vpop.permute.xlu1 %453 }
  0xe9   : > { %v537_v13 = vpop.permute.xlu0 %536 }
  0xea   : > { %1352 = vmatmul.mubr.msk.bf16.gmra.mrb[4].mxu1 %vm369_vm1, %v368_v10  ;;  %1367 = vmatprep.mubr.msk.bf16.mxu0 %vm369_vm1, %v537_v13  ;;  %v539_v16 = vpop.permute.xlu1 %538 }
  0xeb   : > { %1357 = vmatprep.mubr.msk.bf16.mxu1 %vm369_vm1, %v1935_v11  ;;  %1368 = vmatmul.mubr.msk.bf16.vlgmr.msra.gmra.mrb[0].mxu0 %vm369_vm1, %v539_v16  ;;  %v1016_v16 = vsel %vm382_vm0, %v1010_v40, 0 }
  0xec   : > { %1301 = vmatpush3.bf16.msra.mxu0 %v1486_v14 }
  0xed   : > { %v1944_v17 = vpop.permute.xlu0 %455  ;;  %1302 = vmatprep.subr.bf16.mxu0 %v1487_v15 }
  0xee   : > { %v1946_v19 = vpop.permute.xlu1 %457 }
  0xf0   : > { %1303 = vmatpush3.bf16.msra.mxu0 %v1488_v18 }
  0xf1   : > { %v541_v21 = vpop.permute.xlu0 %540  ;;  %1304 = vmatprep.subr.bf16.mxu0 %v1489_v20 }
  0xf2   : > { %1358 = vmatmul.mubr.msk.bf16.vlgmr.msra.gmra.mrb[8].mxu1 %vm369_vm1, %v1937_v12  ;;  %1371 = vmatprep.mubr.msk.bf16.mxu0 %vm369_vm1, %v541_v21  ;;  %v543_v24 = vpop.permute.xlu1 %542 }
  0xf3   : > { %1361 = vmatprep.mubr.msk.bf16.mxu1 %vm369_vm1, %v1944_v17  ;;  %1372 = vmatmul.mubr.msk.bf16.gmra.mrb[4].mxu0 %vm369_vm1, %v543_v24 }
  0xf4   : > { %1305 = vmatpush3.bf16.msra.mxu0 %v1490_v22  ;;  %956 = vmatprep.mubr.bf16.mxu0 %v1501_v34 }
  0xf5   : > { %1306 = vmatprep.subr.bf16.mxu0 %v1491_v23  ;;  %1376 = vmatpush3.bf16.msra.mxu1 %v1502_v35 }
  0xf6   : > { %1377 = vmatprep.subr.bf16.mxu1 %v1504_v37 }
  0xf8   : > { %1307 = vmatpush3.bf16.msra.mxu0 %v1492_v25 }
  0xf9   : > { %1308 = vmatprep.subr.bf16.mxu0 %v1493_v26  ;;  %1378 = vmatpush3.bf16.msra.mxu1 %v1504_v37 }
  0xfa   : > { %1362 = vmatmul.mubr.msk.bf16.gmra.mrb[12].mxu1 %vm369_vm1, %v1946_v19  ;;  %1400 = vmatprep.subr.msk.bf16.mxu1 %vm382_vm0, %v1010_v40 }
  0xfc   : > { %1309 = vmatpush3.bf16.msra.mxu0 %v1494_v27 }
  0xfd   : > { %1310 = vmatprep.subr.bf16.mxu0 %v1495_v28 }
 0x100   : > { %1311 = vmatpush3.bf16.msra.mxu0 %v1496_v29 }
 0x101   : > { %1312 = vmatprep.subr.bf16.mxu0 %v1497_v30 }
 0x104   : > { %1313 = vmatpush3.bf16.msra.mxu0 %v1498_v31 }
 0x105   : > { %1314 = vmatprep.subr.bf16.mxu0 %v1499_v32 }
 0x108   : > { %1315 = vmatpush3.bf16.msra.mxu0 %v1500_v33 }
 0x10b   : > { %957 = vmatmul.mubr.bf16.vlgmr.msra.gmra.mrb[8].mxu0 %v1902_v0 }
 0x10c   : > { %964 = vmatprep.mubr.bf16.mxu0 %v1503_v36 }
 0x113   : > { %965 = vmatmul.mubr.bf16.gmra.mrb[12].mxu0 %v1905_v1 }
 0x114   : > { %972 = vmatprep.mubr.bf16.mxu0 %v1505_v38 }
 0x11b   : > { %973 = vmatmul.mubr.bf16.gmra.mrb[16].mxu0 %v1909_v2  ;;  %v629_v2 = vadd.s32 56, %v1968_v48 }
 0x11c   : > { %980 = vmatprep.mubr.bf16.mxu0 %v1506_v39 }
 0x11d   : > { %vm669_vm3 = vcmp.eq.s32.totalorder %v629_v2, 63 }
 0x123   : > { %981 = vmatmul.mubr.bf16.gmra.mrb[20].mxu0 %v1912_v3 }
 0x1b5   : > { %v1349_v41 = vpop.f32.mrb[0].mxu1 }
 0x1b6   : > { %v420_v42 = vpop.f32.mrb[1].mxu1 }
 0x1b7   : > { %v1350_v43 = vpop.f32.mrb[2].mxu1  ;;  %v654_v56 = vsel %vm630_vm2, -inf, %v420_v42 }
 0x1b8   : > { %v423_v44 = vpop.f32.mrb[3].mxu1 }
 0x1bd   : > { %v1353_v46 = vpop.f32.mrb[4].mxu1 }
 0x1be   : > { %v436_v47 = vpop.f32.mrb[5].mxu1  ;;  %v1369_v50 = vpop.f32.mrb[0].mxu0 }
 0x1bf   : > { %v1354_v49 = vpop.f32.mrb[6].mxu1  ;;  %v590_v52 = vpop.f32.mrb[1].mxu0 }
 0x1c0   : > { %v439_v51 = vpop.f32.mrb[7].mxu1  ;;  %v1370_v53 = vpop.f32.mrb[2].mxu0 }
 0x1c1   : > { %v593_v54 = vpop.f32.mrb[3].mxu0 }
 0x1c5   : > { %v1359_v55 = vpop.f32.mrb[8].mxu1 }
 0x1c6   : > { %v696_v57 = vmax.f32 %v1349_v41, %v1359_v55  ;;  %v505_v58 = vpop.f32.mrb[9].mxu1  ;;  %v1373_v61 = vpop.f32.mrb[4].mxu0 }
 0x1c7   : > { %v694_v59 = vmax.f32 %v654_v56, %v505_v58  ;;  %v1360_v60 = vpop.f32.mrb[10].mxu1  ;;  %v606_v1 = vpop.f32.mrb[5].mxu0 }
 0x1c8   : > { %v704_v62 = vmax.f32 %v696_v57, %v1369_v50  ;;  %v697_v63 = vmax.f32 %v1350_v43, %v1360_v60  ;;  %v508_v0 = vpop.f32.mrb[11].mxu1  ;;  %v1374_v5 = vpop.f32.mrb[6].mxu0 }
 0x1c9   : > { %v702_v3 = vmax.f32 %v694_v59, %v590_v52  ;;  %v695_v4 = vmax.f32 %v423_v44, %v508_v0  ;;  %v609_v7 = vpop.f32.mrb[7].mxu0  ;;  %v693_v20 = vsel %vm669_vm3, -inf, %v1374_v5  ;;  %v992_v52 = vsub.s32 0, %v1968_v48 }
 0x1ca   : > { %v705_v6 = vmax.f32 %v697_v63, %v1370_v53  ;;  %v989_v53 = vld [vmem:[%s2058_s5] sm:$0x3] }
 0x1cb   : > { %v703_v8 = vmax.f32 %v695_v4, %v593_v54  ;;  %v993_v54 = vrot.slane %v989_v53, %v992_v52  ;;  %v1013_v4 = vsub.s32 1, %v1968_v48 }
 0x1cc   : > { %v711_v9 = vpack.c.bf16 %v705_v6, %v704_v62 }
 0x1cd   : > { %v710_v10 = vpack.c.bf16 %v703_v8, %v702_v3  ;;  %v1363_v13 = vpop.f32.mrb[12].mxu1 }
 0x1ce   : > { %v700_v14 = vmax.f32 %v1353_v46, %v1363_v13  ;;  %v521_v15 = vpop.f32.mrb[13].mxu1 }
 0x1cf   : > { %v698_v18 = vmax.f32 %v436_v47, %v521_v15  ;;  %v1364_v21 = vpop.f32.mrb[14].mxu1  ;;  %1379 = vmatprep.mubr.msk.bf16.mxu1 %vm730_vm4, %v710_v10 }
 0x1d0   : > { %v708_v22 = vmax.f32 %v700_v14, %v1373_v61  ;;  %v701_v23 = vmax.f32 %v1354_v49, %v1364_v21  ;;  %v524_v24 = vpop.f32.mrb[15].mxu1  ;;  %1380 = vmatmul.mubr.msk.bf16.vlgmr.msra.gmra.mrb[16].mxu1 %vm730_vm4, %v711_v9 }
 0x1d1   : > { %v706_v25 = vmax.f32 %v698_v18, %v606_v1  ;;  %v699_v26 = vmax.f32 %v439_v51, %v524_v24  ;;  %1388 = vmatpush3.bf16.msra.mxu1 %v1016_v16  ;;  %v1014_v16 = vrot.slane %v989_v53, %v1013_v4 }
 0x1d2   : > { %v709_v27 = vmax.f32 %v701_v23, %v693_v20 }
 0x1d3   : > { %v707_v28 = vmax.f32 %v699_v26, %v609_v7 }
 0x1d4   : > { %v713_v29 = vpack.c.bf16 %v709_v27, %v708_v22 }
 0x1d5   : > { %v712_v30 = vpack.c.bf16 %v707_v28, %v706_v25 }
 0x1d7   : > { %1383 = vmatprep.mubr.msk.bf16.mxu1 %vm730_vm4, %v712_v30 }
 0x1d8   : > { %1384 = vmatmul.mubr.msk.bf16.gmra.mrb[20].mxu1 %vm730_vm4, %v713_v29 }
 0x1d9   : > { %1389 = vmatprep.mubr.msk.bf16.mxu1 %vm369_vm1, %v1935_v11 }
 0x1de   : > { %v1316_v31 = vpop.f32.mrb[8].mxu0 }
 0x1df   : > { %v1317_v32 = vpop.f32.mrb[9].mxu0 }
 0x1e0   : > { %1390 = vmatmul.mubr.msk.bf16.vlgmr.msra.gmra.mrb[24].mxu1 %vm369_vm1, %v1937_v12  ;;  %v1318_v33 = vadd.f32 %v1317_v32, %v1316_v31  ;;  %v1319_v34 = vpop.f32.mrb[10].mxu0 }
 0x1e1   : > { %1393 = vmatprep.mubr.msk.bf16.mxu1 %vm369_vm1, %v1944_v17  ;;  %v1320_v35 = vpop.f32.mrb[11].mxu0 }
 0x1e2   : > { %v1321_v36 = vadd.f32 %v1320_v35, %v1319_v34 }
 0x1e6   : > { %v1322_v37 = vpop.f32.mrb[12].mxu0 }
 0x1e7   : > { %v1323_v38 = vpop.f32.mrb[13].mxu0 }
 0x1e8   : > { %1394 = vmatmul.mubr.msk.bf16.gmra.mrb[28].mxu1 %vm369_vm1, %v1946_v19  ;;  %v1324_v39 = vadd.f32 %v1323_v38, %v1322_v37  ;;  %v1325_v40 = vpop.f32.mrb[14].mxu0 }
 0x1e9   : > { %v1326_v11 = vpop.f32.mrb[15].mxu0 }
 0x1ea   : > { %v1327_v41 = vadd.f32 %v1326_v11, %v1325_v40 }
 0x1ee   : > { %v1328_v42 = vpop.f32.mrb[16].mxu0 }
 0x1ef   : > { %v1329_v12 = vpop.f32.mrb[17].mxu0 }
 0x1f0   : > { %v1331_v43 = vpop.f32.mrb[18].mxu0  ;;  %v1330_v46 = vadd.f32 %v1329_v12, %v1328_v42 }
 0x1f1   : > { %v1332_v44 = vpop.f32.mrb[19].mxu0 }
 0x1f2   : > { %v1333_v49 = vadd.f32 %v1332_v44, %v1331_v43 }
 0x1f6   : > { %v1334_v17 = vpop.f32.mrb[20].mxu0 }
 0x1f7   : > { %v1335_v45 = vpop.f32.mrb[21].mxu0 }
 0x1f8   : > { %v1336_v19 = vadd.f32 %v1335_v45, %v1334_v17  ;;  %v1337_v47 = vpop.f32.mrb[22].mxu0 }
 0x1f9   : > { %v1338_v50 = vpop.f32.mrb[23].mxu0 }
 0x1fa   : > { %v1339_v51 = vadd.f32 %v1338_v50, %v1337_v47 }
 0x2a3   : > { %v1381_v55 = vpop.f32.mrb[16].mxu1 }
 0x2a4   : > { %v967_v56 = vadd.f32 %v1381_v55, %v1324_v39  ;;  %v777_v57 = vpop.f32.mrb[17].mxu1 }
 0x2a5   : > { %v959_v58 = vadd.f32 %v1318_v33, %v777_v57  ;;  %v1382_v59 = vpop.f32.mrb[18].mxu1 }
 0x2a6   : > { %v996_v60 = vadd.f32 %v993_v54, %v967_v56  ;;  %v970_v61 = vadd.f32 %v1382_v59, %v1327_v41  ;;  %v780_v62 = vpop.f32.mrb[19].mxu1 }
 0x2a7   : > { %v994_v63 = vadd.f32 %v993_v54, %v959_v58  ;;  %v962_v0 = vadd.f32 %v1321_v36, %v780_v62 }
 0x2a8   : > { %v997_v1 = vadd.f32 %v993_v54, %v970_v61  ;;  %v1004_v22 = vmax.f32 %v996_v60, 0.0 }
 0x2a9   : > { %v995_v2 = vadd.f32 %v993_v54, %v962_v0  ;;  %v1002_v25 = vmax.f32 %v994_v63, 0.0 }
 0x2aa   : > { %v1005_v27 = vmax.f32 %v997_v1, 0.0 }
 0x2ab   : > { %v1385_v3 = vpop.f32.mrb[20].mxu1  ;;  %v1003_v31 = vmax.f32 %v995_v2, 0.0 }
 0x2ac   : > { %v983_v5 = vadd.f32 %v1385_v3, %v1336_v19  ;;  %v793_v6 = vpop.f32.mrb[21].mxu1 }
 0x2ad   : > { %v975_v7 = vadd.f32 %v1330_v46, %v793_v6  ;;  %v1386_v8 = vpop.f32.mrb[22].mxu1 }
 0x2ae   : > { %v1000_v9 = vadd.f32 %v993_v54, %v983_v5  ;;  %v986_v10 = vadd.f32 %v1386_v8, %v1339_v51  ;;  %v796_v13 = vpop.f32.mrb[23].mxu1 }
 0x2af   : > { %v998_v14 = vadd.f32 %v993_v54, %v975_v7  ;;  %v978_v15 = vadd.f32 %v1333_v49, %v796_v13 }
 0x2b0   : > { %v1001_v18 = vadd.f32 %v993_v54, %v986_v10  ;;  %v1008_v11 = vmax.f32 %v1000_v9, 0.0 }
 0x2b1   : > { %v999_v20 = vadd.f32 %v993_v54, %v978_v15  ;;  %v1006_v12 = vmax.f32 %v998_v14, 0.0 }
 0x2b2   : > { %v1009_v17 = vmax.f32 %v1001_v18, 0.0 }
 0x2b3   : > { %v1391_v21 = vpop.f32.mrb[24].mxu1  ;;  %v1007_v47 = vmax.f32 %v999_v20, 0.0 }
 0x2b4   : > { %v1061_v23 = vadd.f32 %v1391_v21, %v1014_v16  ;;  %v1052_v24 = vpop.f32.mrb[25].mxu1 }
 0x2b5   : > { %v1053_v26 = vadd.f32 %v1052_v24, %v1014_v16  ;;  %v1392_v48 = vpop.f32.mrb[26].mxu1 }
 0x2b6   : > { %v1085_v28 = vadd.f32 %v1061_v23, %v1004_v22  ;;  %v1064_v29 = vadd.f32 %v1392_v48, %v1014_v16  ;;  %v1055_v30 = vpop.f32.mrb[27].mxu1 }
 0x2b7   : > { %v1083_v32 = vadd.f32 %v1053_v26, %v1002_v25  ;;  %v1056_v33 = vadd.f32 %v1055_v30, %v1014_v16 }
 0x2b8   : > { %v1093_v34 = vmax.f32 %v1085_v28, 0.0  ;;  %v1086_v35 = vadd.f32 %v1064_v29, %v1005_v27 }
 0x2b9   : > { %v1091_v36 = vmax.f32 %v1083_v32, 0.0  ;;  %v1084_v37 = vadd.f32 %v1056_v33, %v1003_v31 }
 0x2ba   : > { %1101 = vst [vmem:[%s1992_s18 + $0x10] sm:$0xff] %v1093_v34  ;;  %v1094_v38 = vmax.f32 %v1086_v35, 0.0 }
 0x2bb   : > { %1099 = vst [vmem:[%s1992_s18] sm:$0xff] %v1091_v36  ;;  %v1092_v39 = vmax.f32 %v1084_v37, 0.0  ;;  %v1395_v40 = vpop.f32.mrb[28].mxu1 }
 0x2bc   : > { %1102 = vst [vmem:[%s1992_s18 + $0x18] sm:$0xff] %v1094_v38  ;;  %v1077_v41 = vadd.f32 %v1395_v40, %v1014_v16  ;;  %v1068_v42 = vpop.f32.mrb[29].mxu1 }
 0x2bd   : > { %1100 = vst [vmem:[%s1992_s18 + $0x8] sm:$0xff] %v1092_v39  ;;  %v1069_v43 = vadd.f32 %v1068_v42, %v1014_v16  ;;  %v1396_v44 = vpop.f32.mrb[30].mxu1 }
 0x2be   : > { %v1089_v45 = vadd.f32 %v1077_v41, %v1008_v11  ;;  %v1080_v46 = vadd.f32 %v1396_v44, %v1014_v16  ;;  %v1071_v19 = vpop.f32.mrb[31].mxu1 }
 0x2bf   : > { %v1087_v49 = vadd.f32 %v1069_v43, %v1006_v12  ;;  %v1072_v50 = vadd.f32 %v1071_v19, %v1014_v16 }
 0x2c0   : > { %v1097_v51 = vmax.f32 %v1089_v45, 0.0  ;;  %v1090_v52 = vadd.f32 %v1080_v46, %v1009_v17 }
 0x2c1   : > { %v1095_v53 = vmax.f32 %v1087_v49, 0.0  ;;  %v1088_v54 = vadd.f32 %v1072_v50, %v1007_v47 }
 0x2c2   : > { %1105 = vst [vmem:[%s1992_s18 + $0x30] sm:$0xff] %v1097_v51  ;;  %v1098_v55 = vmax.f32 %v1090_v52, 0.0 }
 0x2c3   : > { %1103 = vst [vmem:[%s1992_s18 + $0x20] sm:$0xff] %v1095_v53  ;;  %v1096_v56 = vmax.f32 %v1088_v54, 0.0 }
 0x2c4   : > { %1106 = vst [vmem:[%s1992_s18 + $0x38] sm:$0xff] %v1098_v55 }
 0x2c5   : > { %1104 = vst [vmem:[%s1992_s18 + $0x28] sm:$0xff] %v1096_v56 }
 0x2c6   : > { %1606 = shalt.err (!%p1603_p2)
}
 0x2c7   : > { %s1607_s17 = scalar_lea.hbm %s2006_s29, 1024  ;;  %s1611_s8 = scalar_lea.hbm %s2059_s6, 2048 }
 0x2c8   : > { %p1608_p13 = scmp.ne.s32.totalorder %s2006_s29, %s1607_s17  ;;  %p1612_p4 = scmp.lt.u32.totalorder %s2006_s29, %s2059_s6 }
 0x2c9   : > { %p1613_p5 = scmp.lt.u32.totalorder %s1611_s8, %s1607_s17  ;;  %p1615_p11 = scmp.lt.u32.totalorder %s1607_s17, %s2006_s29 }
 0x2ca   : > { %p1609_p6 = pnand %p1608_p13, %p2073_p0 }
 0x2cb   : > { %p1614_p8 = por %p1613_p5, %p1612_p4 }
 0x2cc   : > { %p1610_p10 = pneg %p1609_p6 }
 0x2cd   : > { %p1616_p1 = por %p1615_p11, %p1614_p8 }
 0x2cf   : > { %p1617_p3 = pnand %p1616_p1, %p1610_p10 }
 0x2d1   : > { %1620 = shalt.err (!%p1617_p3)
}
 0x2d2   : > { %s1676_s19 = smov 128   ;;  %s1677_s12 = smov 8  }
 0x2d3   : > { %1411 = dma.vmem_to_hbm [thread:$0]  (%p2073_p0), %s2000_s30, 1024, %s2006_s29, %s1108_s25, %s1676_s19, %s1676_s19, %s1677_s12  }
 0x2d4 PF: > { %s1136_s27 = sand.u32 1, %s1651_s21   ;;  %p2074_p7 = scmp.ne.s32.totalorder %s2064_s28, 0 }
 0x2d5   : > { %p2075_p9 = scmp.ge.s32.totalorder %s1663_s24, 2  ;;  %s1137_s14 = scalar_lea.sflag [#allocation4], %s1136_s27 }
 0x2d7   : > { %p1425_p12 = pnand %p2075_p9, %p2074_p7 }
 0x2d9   : > { %1646 = dma.done.wait (!%p1425_p12), %s1137_s14, 1024  }
 0x2da   : > { %1648 = vsyncadd (!%p1425_p12), %s1137_s14, 4294966272  ;;  %p20_p2 = scmp.ge.s32.totalorder %s1823_s26, 4   ;;  %s2076_s21 = smov %s1655_s22 }
 0x2db   : > { %s2077_s22 = smov %s1659_s23  ;;  %s2078_s23 = smov %s1839_s11 }
 0x2dc   : > { %s2079_s24 = smov %s1823_s26  ;;  %22 = sbr.rel (!%p20_p2) target bundleno = 6 (0x6), region = 97 }
 0x2e3   :  { %1142 = vsyncpa [#allocation3], 1 }
 0x2e4   :  { %1144 = vsyncpa [#allocation3 + $0x1], 1 }
 0x2e5   :  { %1145 = vsyncpa [#allocation6], 1 }
 0x2e6   :  { %1146 = vsyncpa [#allocation4], 1 }
 0x2e7   :  { %1148 = vsyncpa [#allocation4 + $0x1], 1 }

</bundles_post_ra>
